<compile_context>
chip_gen: v6e
topology: v6e:2x2x1
jax: 0.10.0
libtpu: 0.0.40
codegen_flags: <defaults>
</compile_context>

<pallas_src>
import functools
import math

import jax
import jax.numpy as jnp
from jax.experimental import pallas as pl
from jax.experimental.pallas import tpu as pltpu


def _encoder_seq_kernel(x_ref, h0_ref, c0_ref,
                        w1_ref, b1_ref, wi_ref, wh_ref, b2_ref,
                        h_out_ref, c_out_ref,
                        px_sc,
                        *, hidden_size: int, seq_len: int, batch_tile: int,
                        unroll):
    """Whole-sequence MetaEncoderRNN for one batch tile (time loop in-kernel)."""
    H = hidden_size
    T = seq_len
    Bt = batch_tile

    # ---- Phase 1: batched input projection for the whole sequence ----------
    # (T*Bt, I) @ (I, E) -> relu -> (T*Bt, E) @ (E, 4H) + (bi + bh)
    # None of this depends on h, so it does not belong on the serial path.
    x = x_ref[0]                                            # (T*Bt, I)
    emb = jnp.dot(x, w1_ref[...], preferred_element_type=jnp.float32) + b1_ref[...]
    emb = jnp.maximum(emb, 0.0)
    px_sc[...] = (jnp.dot(emb, wi_ref[...], preferred_element_type=jnp.float32)
                  + b2_ref[...])

    # ---- Phase 2: serial recurrence: one small matmul + gates per step -----
    wh = wh_ref[...]                                        # hoisted, loop-invariant

    def step(t, carry):
        h, c = carry
        start = t * Bt
        if Bt % 8 == 0:
            start = pl.multiple_of(start, 8)                # aligned sublane slice
        px = px_sc[pl.ds(start, Bt), :]                     # (Bt, 4H) precomputed part
        preact = px + jnp.dot(h, wh, preferred_element_type=jnp.float32)

        # Module's gate packing: first 3H -> sigmoid as (i, f, o); last H -> tanh g.
        # At H=16 these sub-lane-tile slices are a few masked lane selects per
        # step; with H a multiple of 128 they become free view slices.
        gates = jax.nn.sigmoid(preact[:, :3 * H])
        g_t = jnp.tanh(preact[:, 3 * H:])
        i_t = gates[:, :H]
        f_t = gates[:, H:2 * H]
        o_t = gates[:, 2 * H:3 * H]

        c_t = c * f_t + i_t * g_t
        h_t = o_t * jnp.tanh(c_t)
        return (h_t, c_t)

    h_T, c_T = jax.lax.fori_loop(0, T, step, (h0_ref[...], c0_ref[...]),
                                 unroll=unroll)

    # Final state written back to HBM exactly once per batch tile.
    h_out_ref[...] = h_T.astype(h_out_ref.dtype)
    c_out_ref[...] = c_T.astype(c_out_ref.dtype)


def meta_encoder_rnn_sequence(x_seq, hidden, params, *, batch_tile=None,
                              unroll=None):
    """Run T steps of MetaEncoderRNN fused into one Pallas kernel.

    x_seq  : (T, B, input_size) float32
    hidden : (h0, c0), each (B, hidden_size) float32
    params : PyTorch-convention weights (see init_params)
    returns final (h_T, c_T)
    """
    h0, c0 = hidden
    T, B, I = x_seq.shape
    E = params["linear1_w"].shape[0]
    H = params["h2h_w"].shape[1]

    if batch_tile is None:
        # Split the batch when large enough so the "parallel" grid axis has
        # extent >= 2 and can occupy both v7x TensorCores (no-op on v5e/v6e).
        batch_tile = B // 2 if (B >= 16 and (B // 2) % 8 == 0) else B
    Bt = batch_tile
    # Bt == B with B not a multiple of 8 is allowed (padded partial sublane
    # tile, rows aren't free); otherwise Bt must be a multiple of 8.
    assert B % Bt == 0 and (Bt == B or Bt % 8 == 0), "bad batch tile"
    G = B // Bt

    if unroll is None:
        unroll = True if T <= 8 else 4      # full unroll for short fixed T

    # Host-side glue: weights to (in, out); fold the two LSTM biases; regroup
    # x_seq (T, B, I) -> (G, T*Bt, I) so each batch tile's whole sequence is a
    # single contiguous GEMM operand in the kernel (layout plumbing only).
    w1 = params["linear1_w"].T                               # (I, E)
    b1 = params["linear1_b"].reshape(1, -1)                  # (1, E)
    wi = params["i2h_w"].T                                   # (E, 4H)
    wh = params["h2h_w"].T                                   # (H, 4H)
    b2 = (params["i2h_b"] + params["h2h_b"]).reshape(1, -1)  # (1, 4H)
    x_grp = (x_seq.reshape(T, G, Bt, I)
                  .transpose(1, 0, 2, 3)
                  .reshape(G, T * Bt, I))

    const2 = lambda b: (0, 0)   # weights/biases: VMEM-resident across the grid

    kernel = pl.pallas_call(
        functools.partial(_encoder_seq_kernel, hidden_size=H, seq_len=T,
                          batch_tile=Bt, unroll=unroll),
        out_shape=(jax.ShapeDtypeStruct((B, H), jnp.float32),
                   jax.ShapeDtypeStruct((B, H), jnp.float32)),
        grid_spec=pltpu.PrefetchScalarGridSpec(
            num_scalar_prefetch=0,
            grid=(G,),
            in_specs=[
                pl.BlockSpec((1, T * Bt, I), lambda b: (b, 0, 0)),   # x (full seq, this tile)
                pl.BlockSpec((Bt, H), lambda b: (b, 0)),             # h0
                pl.BlockSpec((Bt, H), lambda b: (b, 0)),             # c0
                pl.BlockSpec((I, E), const2),                        # w1
                pl.BlockSpec((1, E), const2),                        # b1
                pl.BlockSpec((E, 4 * H), const2),                    # wi
                pl.BlockSpec((H, 4 * H), const2),                    # wh
                pl.BlockSpec((1, 4 * H), const2),                    # bi + bh
            ],
            out_specs=(pl.BlockSpec((Bt, H), lambda b: (b, 0)),
                       pl.BlockSpec((Bt, H), lambda b: (b, 0))),
            # Precomputed input projections for the whole sequence.  For very
            # long T at scaled H, chunk T instead so this stays within VMEM.
            scratch_shapes=[pltpu.VMEM((T * Bt, 4 * H), jnp.float32)],
        ),
        compiler_params=pltpu.CompilerParams(
            dimension_semantics=("parallel",)),
    )
    h_t, c_t = kernel(x_grp, h0, c0, w1, b1, wi, wh, b2)
    return h_t, c_t


def meta_encoder_rnn_forward(x, hidden, params):
    """Single-step forward (exact semantics of MetaEncoderRNN.forward)."""
    return meta_encoder_rnn_sequence(x[None], hidden, params)


def init_params(key, input_size=2, embedding_size=8, hidden_size=16):
    """Deterministic synthetic init mirroring the PyTorch module's __init__."""
    k1, k2, k3, k4, k5 = jax.random.split(key, 5)

    # linear1: xavier_uniform weights, zero bias
    limit = math.sqrt(6.0 / (input_size + embedding_size))
    linear1_w = jax.random.uniform(k1, (embedding_size, input_size),
                                   minval=-limit, maxval=limit, dtype=jnp.float32)
    linear1_b = jnp.zeros((embedding_size,), dtype=jnp.float32)

    # MetaLSTMCell.reset_parameters: uniform(-std, std), std = 1/sqrt(hidden)
    std = 1.0 / math.sqrt(hidden_size)
    i2h_w = jax.random.uniform(k2, (4 * hidden_size, embedding_size),
                               minval=-std, maxval=std, dtype=jnp.float32)
    i2h_b = jax.random.uniform(k3, (4 * hidden_size,),
                               minval=-std, maxval=std, dtype=jnp.float32)
    h2h_w = jax.random.uniform(k4, (4 * hidden_size, hidden_size),
                               minval=-std, maxval=std, dtype=jnp.float32)
    h2h_b = jax.random.uniform(k5, (4 * hidden_size,),
                               minval=-std, maxval=std, dtype=jnp.float32)

    return {"linear1_w": linear1_w, "linear1_b": linear1_b,
            "i2h_w": i2h_w, "i2h_b": i2h_b,
            "h2h_w": h2h_w, "h2h_b": h2h_b}


def _reference_step(x, hidden, p):
    """Pure-JAX reference implementing the exact PyTorch semantics (one step)."""
    h, c = hidden
    H = p["h2h_w"].shape[1]
    emb = jax.nn.relu(x @ p["linear1_w"].T + p["linear1_b"])
    preact = emb @ p["i2h_w"].T + p["i2h_b"] + h @ p["h2h_w"].T + p["h2h_b"]
    gates = jax.nn.sigmoid(preact[:, :3 * H])
    g = jnp.tanh(preact[:, 3 * H:])
    i, f, o = gates[:, :H], gates[:, H:2 * H], gates[:, 2 * H:3 * H]
    c_t = c * f + i * g
    h_t = o * jnp.tanh(c_t)
    return h_t, c_t


def _reference_sequence(x_seq, hidden, p):
    def step(carry, x_t):
        return _reference_step(x_t, carry, p), None
    (h, c), _ = jax.lax.scan(step, hidden, x_seq)
    return h, c


if __name__ == "__main__":
    key = jax.random.PRNGKey(0)
    k_param, k_x, k_h, k_c, k_x2, k_h2, k_c2 = jax.random.split(key, 7)

    B, INPUT, EMB, HID, T = 8, 2, 8, 16, 6
    params = init_params(k_param, INPUT, EMB, HID)

    x_seq = jax.random.normal(k_x, (T, B, INPUT), dtype=jnp.float32)
    h0 = jax.random.normal(k_h, (B, HID), dtype=jnp.float32) * 0.1
    c0 = jax.random.normal(k_c, (B, HID), dtype=jnp.float32) * 0.1

    # Single-step forward (the original module's forward semantics).
    h1, c1 = meta_encoder_rnn_forward(x_seq[0], (h0, c0), params)
    jax.block_until_ready((h1, c1))
    h1_ref, c1_ref = _reference_step(x_seq[0], (h0, c0), params)
    assert jnp.allclose(h1, h1_ref, atol=1e-4, rtol=1e-4), "single-step h_t mismatch"
    assert jnp.allclose(c1, c1_ref, atol=1e-4, rtol=1e-4), "single-step c_t mismatch"

    # Fused sequence: T steps in ONE pallas_call (time loop in-kernel).
    hT, cT = meta_encoder_rnn_sequence(x_seq, (h0, c0), params)
    jax.block_until_ready((hT, cT))
    hT_ref, cT_ref = _reference_sequence(x_seq, (h0, c0), params)
    assert jnp.allclose(hT, hT_ref, atol=1e-4, rtol=1e-4), "sequence h_T mismatch"
    assert jnp.allclose(cT, cT_ref, atol=1e-4, rtol=1e-4), "sequence c_T mismatch"

    # Multi-tile path (grid extent 2, as used for v7x megacore sharding).
    B2, T2 = 16, 5
    x_seq2 = jax.random.normal(k_x2, (T2, B2, INPUT), dtype=jnp.float32)
    h02 = jax.random.normal(k_h2, (B2, HID), dtype=jnp.float32) * 0.1
    c02 = jax.random.normal(k_c2, (B2, HID), dtype=jnp.float32) * 0.1
    hT2, cT2 = meta_encoder_rnn_sequence(x_seq2, (h02, c02), params,
                                         batch_tile=8)
    jax.block_until_ready((hT2, cT2))
    hT2_ref, cT2_ref = _reference_sequence(x_seq2, (h02, c02), params)
    assert jnp.allclose(hT2, hT2_ref, atol=1e-4, rtol=1e-4), "tiled h_T mismatch"
    assert jnp.allclose(cT2, cT2_ref, atol=1e-4, rtol=1e-4), "tiled c_T mismatch"

    print("KERNEL_OK")
</pallas_src>

<mosaic_0001>
module attributes {stable_mosaic.version = 11 : i64} {
  func.func @_encoder_seq_kernel(%arg0: i32, %arg1: memref<1x8x2xf32, #tpu.memory_space<vmem>>, %arg2: memref<8x16xf32, #tpu.memory_space<vmem>>, %arg3: memref<8x16xf32, #tpu.memory_space<vmem>>, %arg4: memref<2x8xf32, #tpu.memory_space<vmem>>, %arg5: memref<1x8xf32, #tpu.memory_space<vmem>>, %arg6: memref<8x64xf32, #tpu.memory_space<vmem>>, %arg7: memref<16x64xf32, #tpu.memory_space<vmem>>, %arg8: memref<1x64xf32, #tpu.memory_space<vmem>>, %arg9: memref<8x16xf32, #tpu.memory_space<vmem>>, %arg10: memref<8x16xf32, #tpu.memory_space<vmem>>, %arg11: memref<8x64xf32, #tpu.memory_space<vmem>>) attributes {dimension_semantics = [#tpu.dimension_semantics<parallel>], iteration_bounds = array<i64: 1>, scalar_prefetch = 0 : i64, scratch_operands = 1 : i64, tpu.core_type = #tpu.core_type<tc>, window_params = [{transform_indices = @transform_0, window_bounds = array<i64: 1, 8, 2>}, {transform_indices = @transform_1, window_bounds = array<i64: 8, 16>}, {transform_indices = @transform_2, window_bounds = array<i64: 8, 16>}, {pipeline_mode = #tpu.pipeline_mode<synchronous>, transform_indices = @transform_3, window_bounds = array<i64: 2, 8>}, {pipeline_mode = #tpu.pipeline_mode<synchronous>, transform_indices = @transform_4, window_bounds = array<i64: 1, 8>}, {pipeline_mode = #tpu.pipeline_mode<synchronous>, transform_indices = @transform_5, window_bounds = array<i64: 8, 64>}, {pipeline_mode = #tpu.pipeline_mode<synchronous>, transform_indices = @transform_6, window_bounds = array<i64: 16, 64>}, {pipeline_mode = #tpu.pipeline_mode<synchronous>, transform_indices = @transform_7, window_bounds = array<i64: 1, 64>}, {transform_indices = @transform_8, window_bounds = array<i64: 8, 16>}, {transform_indices = @transform_9, window_bounds = array<i64: 8, 16>}]} {
    %c0 = arith.constant 0 : index
    %c0_0 = arith.constant 0 : index
    %c0_1 = arith.constant 0 : index
    %0 = vector.load %arg1[%c0, %c0_0, %c0_1] : memref<1x8x2xf32, #tpu.memory_space<vmem>>, vector<1x8x2xf32>
    %1 = vector.shape_cast %0 : vector<1x8x2xf32> to vector<8x2xf32>
    %c0_2 = arith.constant 0 : index
    %c0_3 = arith.constant 0 : index
    %2 = vector.load %arg4[%c0_2, %c0_3] : memref<2x8xf32, #tpu.memory_space<vmem>>, vector<2x8xf32>
    %cst = arith.constant dense<0.000000e+00> : vector<8x8xf32>
    %3 = tpu.matmul %1, %2, %cst {dimension_numbers = #tpu.dot_dimension_numbers<[1], [0], [0], [1], [0, 0, 1, 1], [], []>} : vector<8x2xf32>, vector<2x8xf32>, vector<8x8xf32> -> vector<8x8xf32>
    %c0_4 = arith.constant 0 : index
    %c0_5 = arith.constant 0 : index
    %4 = vector.load %arg5[%c0_4, %c0_5] : memref<1x8xf32, #tpu.memory_space<vmem>>, vector<1x8xf32>
    %5 = vector.broadcast %4 : vector<1x8xf32> to vector<8x8xf32>
    %6 = arith.addf %3, %5 : vector<8x8xf32>
    %cst_6 = arith.constant 0.000000e+00 : f32
    %7 = vector.broadcast %cst_6 : f32 to vector<8x8xf32>
    %8 = arith.maximumf %6, %7 : vector<8x8xf32>
    %c0_7 = arith.constant 0 : index
    %c0_8 = arith.constant 0 : index
    %9 = vector.load %arg6[%c0_7, %c0_8] : memref<8x64xf32, #tpu.memory_space<vmem>>, vector<8x64xf32>
    %cst_9 = arith.constant dense<0.000000e+00> : vector<8x64xf32>
    %10 = tpu.matmul %8, %9, %cst_9 {dimension_numbers = #tpu.dot_dimension_numbers<[1], [0], [0], [1], [0, 0, 1, 1], [], []>} : vector<8x8xf32>, vector<8x64xf32>, vector<8x64xf32> -> vector<8x64xf32>
    %c0_10 = arith.constant 0 : index
    %c0_11 = arith.constant 0 : index
    %11 = vector.load %arg8[%c0_10, %c0_11] : memref<1x64xf32, #tpu.memory_space<vmem>>, vector<1x64xf32>
    %12 = vector.broadcast %11 : vector<1x64xf32> to vector<8x64xf32>
    %13 = arith.addf %10, %12 : vector<8x64xf32>
    %c0_12 = arith.constant 0 : index
    %c0_13 = arith.constant 0 : index
    %14 = vector.load %arg11[%c0_12, %c0_13] : memref<8x64xf32, #tpu.memory_space<vmem>>, vector<8x64xf32>
    tpu.vector_store %arg11[%c0_12, %c0_13], %13 {strides = array<i32>} : memref<8x64xf32, #tpu.memory_space<vmem>>, vector<8x64xf32>,
    %c0_14 = arith.constant 0 : index
    %c0_15 = arith.constant 0 : index
    %15 = vector.load %arg7[%c0_14, %c0_15] : memref<16x64xf32, #tpu.memory_space<vmem>>, vector<16x64xf32>
    %c0_16 = arith.constant 0 : index
    %c0_17 = arith.constant 0 : index
    %16 = vector.load %arg2[%c0_16, %c0_17] : memref<8x16xf32, #tpu.memory_space<vmem>>, vector<8x16xf32>
    %c0_18 = arith.constant 0 : index
    %c0_19 = arith.constant 0 : index
    %17 = vector.load %arg3[%c0_18, %c0_19] : memref<8x16xf32, #tpu.memory_space<vmem>>, vector<8x16xf32>
    %c0_i32 = arith.constant 0 : i32
    %c8_i32 = arith.constant 8 : i32
    %18 = arith.muli %c0_i32, %c8_i32 : i32
    %19 = tpu.assume_multiple %18, 8 : i32
    %20 = arith.index_cast %19 : i32 to index
    %c0_20 = arith.constant 0 : index
    %21 = vector.load %arg11[%20, %c0_20] : memref<8x64xf32, #tpu.memory_space<vmem>>, vector<8x64xf32>
    %cst_21 = arith.constant dense<0.000000e+00> : vector<8x64xf32>
    %22 = tpu.matmul %16, %15, %cst_21 {dimension_numbers = #tpu.dot_dimension_numbers<[1], [0], [0], [1], [0, 0, 1, 1], [], []>} : vector<8x16xf32>, vector<16x64xf32>, vector<8x64xf32> -> vector<8x64xf32>
    %23 = arith.addf %21, %22 : vector<8x64xf32>
    %24 = vector.extract_strided_slice %23 {offsets = [0, 0], sizes = [8, 48], strides = [1, 1]} : vector<8x64xf32> to vector<8x48xf32>
    %25 = arith.negf %24 : vector<8x48xf32>
    %26 = math.exp %25 : vector<8x48xf32>
    %cst_22 = arith.constant 1.000000e+00 : f32
    %27 = vector.broadcast %cst_22 : f32 to vector<8x48xf32>
    %28 = arith.addf %27, %26 : vector<8x48xf32>
    %29 = arith.divf %27, %28 : vector<8x48xf32>
    %30 = vector.extract_strided_slice %23 {offsets = [0, 48], sizes = [8, 16], strides = [1, 1]} : vector<8x64xf32> to vector<8x16xf32>
    %31 = math.tanh %30 : vector<8x16xf32>
    %32 = vector.extract_strided_slice %29 {offsets = [0, 0], sizes = [8, 16], strides = [1, 1]} : vector<8x48xf32> to vector<8x16xf32>
    %33 = vector.extract_strided_slice %29 {offsets = [0, 16], sizes = [8, 16], strides = [1, 1]} : vector<8x48xf32> to vector<8x16xf32>
    %34 = vector.extract_strided_slice %29 {offsets = [0, 32], sizes = [8, 16], strides = [1, 1]} : vector<8x48xf32> to vector<8x16xf32>
    %35 = arith.mulf %17, %33 : vector<8x16xf32>
    %36 = arith.mulf %32, %31 : vector<8x16xf32>
    %37 = arith.addf %35, %36 : vector<8x16xf32>
    %38 = math.tanh %37 : vector<8x16xf32>
    %39 = arith.mulf %34, %38 : vector<8x16xf32>
    %c1_i32 = arith.constant 1 : i32
    %c0_23 = arith.constant 0 : index
    %c0_24 = arith.constant 0 : index
    %40 = vector.load %arg9[%c0_23, %c0_24] : memref<8x16xf32, #tpu.memory_space<vmem>>, vector<8x16xf32>
    tpu.vector_store %arg9[%c0_23, %c0_24], %39 {strides = array<i32>} : memref<8x16xf32, #tpu.memory_space<vmem>>, vector<8x16xf32>,
    %c0_25 = arith.constant 0 : index
    %c0_26 = arith.constant 0 : index
    %41 = vector.load %arg10[%c0_25, %c0_26] : memref<8x16xf32, #tpu.memory_space<vmem>>, vector<8x16xf32>
    tpu.vector_store %arg10[%c0_25, %c0_26], %37 {strides = array<i32>} : memref<8x16xf32, #tpu.memory_space<vmem>>, vector<8x16xf32>,
    return
  }
  func.func @transform_0(%arg0: i32) -> (i32, i32, i32) {
    %c0_i32 = arith.constant 0 : i32
    %c0_i32_0 = arith.constant 0 : i32
    %c0_i32_1 = arith.constant 0 : i32
    return %arg0, %c0_i32, %c0_i32_0 : i32, i32, i32
  }
  func.func @transform_1(%arg0: i32) -> (i32, i32) {
    %c0_i32 = arith.constant 0 : i32
    %c0_i32_0 = arith.constant 0 : i32
    return %arg0, %c0_i32 : i32, i32
  }
  func.func @transform_2(%arg0: i32) -> (i32, i32) {
    %c0_i32 = arith.constant 0 : i32
    %c0_i32_0 = arith.constant 0 : i32
    return %arg0, %c0_i32 : i32, i32
  }
  func.func @transform_3(%arg0: i32) -> (i32, i32) {
    %c0_i32 = arith.constant 0 : i32
    %c0_i32_0 = arith.constant 0 : i32
    %c0_i32_1 = arith.constant 0 : i32
    return %c0_i32, %c0_i32_0 : i32, i32
  }
  func.func @transform_4(%arg0: i32) -> (i32, i32) {
    %c0_i32 = arith.constant 0 : i32
    %c0_i32_0 = arith.constant 0 : i32
    %c0_i32_1 = arith.constant 0 : i32
    return %c0_i32, %c0_i32_0 : i32, i32
  }
  func.func @transform_5(%arg0: i32) -> (i32, i32) {
    %c0_i32 = arith.constant 0 : i32
    %c0_i32_0 = arith.constant 0 : i32
    %c0_i32_1 = arith.constant 0 : i32
    return %c0_i32, %c0_i32_0 : i32, i32
  }
  func.func @transform_6(%arg0: i32) -> (i32, i32) {
    %c0_i32 = arith.constant 0 : i32
    %c0_i32_0 = arith.constant 0 : i32
    %c0_i32_1 = arith.constant 0 : i32
    return %c0_i32, %c0_i32_0 : i32, i32
  }
  func.func @transform_7(%arg0: i32) -> (i32, i32) {
    %c0_i32 = arith.constant 0 : i32
    %c0_i32_0 = arith.constant 0 : i32
    %c0_i32_1 = arith.constant 0 : i32
    return %c0_i32, %c0_i32_0 : i32, i32
  }
  func.func @transform_8(%arg0: i32) -> (i32, i32) {
    %c0_i32 = arith.constant 0 : i32
    %c0_i32_0 = arith.constant 0 : i32
    return %arg0, %c0_i32 : i32, i32
  }
  func.func @transform_9(%arg0: i32) -> (i32, i32) {
    %c0_i32 = arith.constant 0 : i32
    %c0_i32_0 = arith.constant 0 : i32
    return %arg0, %c0_i32 : i32, i32
  }
}

</mosaic_0001>

<bundles_post_ra>
// kernel: tpu_custom_call.1
= control target key start
LH: loop header
LB: loop body
LE: loop exit
PB: predicated region body
PF: predicated region fallthrough
CT: control target
= control target key end

     0   :  { %15 = vsyncpa [#allocation4], 0  ;;  %s635_s0 = inlined_call_operand.vmem [shape: f32[1,8,2], index: 0, kind: input, shape index: {}]   ;;  %s636_s1 = inlined_call_operand.hbm [shape: f32[8,16], index: 1, kind: input, shape index: {}]   ;;  %s637_s2 = inlined_call_operand.hbm [shape: f32[8,16], index: 2, kind: input, shape index: {}]   ;;  %s638_s3 = inlined_call_operand.vmem [shape: f32[2,8], index: 3, kind: input, shape index: {}]   ;;  %s639_s4 = inlined_call_operand.vmem [shape: f32[1,8], index: 4, kind: input, shape index: {}]   ;;  %s640_s5 = inlined_call_operand.hbm [shape: f32[8,64], index: 5, kind: input, shape index: {}]   ;;  %s641_s6 = inlined_call_operand.vmem [shape: f32[16,64], index: 6, kind: input, shape index: {}]   ;;  %s642_s7 = inlined_call_operand.vmem [shape: f32[1,64], index: 7, kind: input, shape index: {}]   ;;  %s643_s8 = inlined_call_operand.hbm [shape: f32[8,16], index: 8, kind: output, shape index: {0}]   ;;  %s644_s9 = inlined_call_operand.hbm [shape: f32[8,16], index: 9, kind: output, shape index: {1}]  }
   0x1   :  { %16 = vsyncpa [#allocation7], 0 }
   0x2   :  { %17 = vsyncpa [#allocation5], 0 }
   0x3   :  { %18 = vsyncpa [#allocation11], 0  ;;  %s538_s30 = smov [#allocation6]   ;;  %s539_s11 = smov [#allocation3]  }
   0x4   :  { %s37_s10 = sshll.u32 %s538_s30, 4  ;;  %s27_s12 = sshll.u32 %s539_s11, 4  ;;  %s38_s10 = int_to_ptr.vmem [resolvable:$true] %s37_s10  ;;  %s28_s12 = int_to_ptr.vmem [resolvable:$true] %s27_s12 }
   0x5   :  { %s438_s13 = scalar_lea.vmem %s38_s10, 128  ;;  %p443_p1 = scmp.lt.s32.totalorder %s38_s10, %s38_s10 }
   0x6   :  { %p439_p0 = scmp.ne.s32.totalorder %s38_s10, %s438_s13  ;;  %p444_p2 = scmp.lt.s32.totalorder %s438_s13, %s438_s13 }
   0x8   :  { %p445_p3 = por %p444_p2, %p443_p1 }
   0xa   :  { %p446_p4 = pnand %p445_p3, %p439_p0 }
   0xc   :  { %449 = shalt.err (!%p446_p4)
}
   0xd   :  { %40 = dma.hbm_to_vmem [thread:$0]  %s637_s2, 128, %s38_s10, [#allocation7]  }
   0xe   :  { %s458_s16 = scalar_lea.vmem %s28_s12, 128  ;;  %p463_p6 = scmp.lt.s32.totalorder %s28_s12, %s28_s12 }
   0xf   :  { %p459_p5 = scmp.ne.s32.totalorder %s28_s12, %s458_s16  ;;  %p464_p7 = scmp.lt.s32.totalorder %s458_s16, %s458_s16 }
  0x11   :  { %p465_p8 = por %p464_p7, %p463_p6 }
  0x13   :  { %p466_p9 = pnand %p465_p8, %p459_p5 }
  0x15   :  { %469 = shalt.err (!%p466_p9)
}
  0x16   :  { %30 = dma.hbm_to_vmem [thread:$0]  %s636_s1, 128, %s28_s12, [#allocation4]  }
  0x17   :  { %s540_s19 = smov [#allocation8]  }
  0x18   :  { %s51_s20 = sshll.u32 %s540_s19, 4  ;;  %s52_s20 = int_to_ptr.vmem [resolvable:$true] %s51_s20 }
  0x19   :  { %s478_s21 = scalar_lea.vmem %s52_s20, 128  ;;  %p483_p11 = scmp.lt.s32.totalorder %s52_s20, %s52_s20 }
  0x1a   :  { %p479_p10 = scmp.ne.s32.totalorder %s52_s20, %s478_s21  ;;  %p484_p12 = scmp.lt.s32.totalorder %s478_s21, %s478_s21 }
  0x1c   :  { %p485_p13 = por %p484_p12, %p483_p11 }
  0x1e   :  { %p486_p0 = pnand %p485_p13, %p479_p10 }
  0x20   :  { %489 = shalt.err (!%p486_p0)
}
  0x21   :  { %54 = dma.hbm_to_vmem [thread:$0]  %s640_s5, 128, %s52_s20, [#allocation7]  }
  0x22   :  { %530 = dma.done.wait [#allocation4], 128  }
  0x23   :  { %531 = vsyncadd [#allocation4], 4294967168 }
  0x24   :  { %532 = dma.done.wait [#allocation7], 256  }
  0x25   :  { %533 = vsyncadd [#allocation7], 4294967040  ;;  %v541_v0 = vmov 0.0   ;;  %vm542_vm0 = vmmov 0   ;;  %vm81_vm1 = vcmask 1041408   ;;  %vm77_vm2 = vcmask 15360  }
  0x26   :  { %394 = vmatprep.subr.mxu0 %v541_v0  ;;  %396 = vmatprep.mubr.msk.f32.mxu0 %vm542_vm0, %v541_v0  ;;  %v69_v1 = vld [vmem:[%s638_s3] sm:$0x3]  ;;  %v156_v3 = vld [vmem:[#allocation8] sm:$0xff]  ;;  %v241_v4 = vld [vmem:[%s641_s6 + $0x8] sm:$0xff]  ;;  %vm245_vm3 = vcmask 130048   ;;  %vm164_vm4 = vcmask 64512  }
  0x27   :  { %399 = vmatprep.subr.mxu1 %v541_v0  ;;  %401 = vmatprep.mubr.msk.f32.mxu1 %vm542_vm0, %v541_v0  ;;  %v68_v2 = vld [vmem:[%s635_s0] sm:$0xff]  ;;  %v242_v6 = vld [vmem:[#allocation3] sm:$0xff]  ;;  %vm238_vm5 = vcmask 523264   ;;  %s544_s30 = smov 80   ;;  %v243_v26 = vld [vmem:[#allocation6] sm:$0xff]  ;;  %s546_s10 = smov [#allocation10]  }
  0x28   :  { %395 = vmatpush3.msk.msra.mxu0 %vm81_vm1, %v69_v1  ;;  %400 = vmatpush3.msra.mxu1 %v156_v3  ;;  %v240_v5 = vld [vmem:[%s641_s6] sm:$0xff]  ;;  %s366_s11 = sshll.u32 %s546_s10, 4  ;;  %s367_s11 = int_to_ptr.vmem [resolvable:$true] %s366_s11 }
  0x29   :  { %397 = vmatmul.mubr.msk.f32.vlgmr.msra.gmra.mxu0 %vm77_vm2, %v68_v2  ;;  %404 = vmatprep.subr.mxu0 %v541_v0  ;;  %v380_v7 = vld [vmem:[%s639_s4] ss:$0 sm:$0xff]  ;;  %s543_s4 = smov 112   ;;  %s490_s12 = scalar_lea.vmem %s367_s11, 128 }
  0x2a   :  { %408 = vmatprep.mubr.msk.f32.mxu0 %vm542_vm0, %v541_v0  ;;  %405 = vmatpush3.msra.mxu0 %v241_v4  ;;  %v383_v14 = vld [vmem:[%s642_s7] ss:$0 sm:$0xff]  ;;  %s545_s7 = smov 32   ;;  %p491_p1 = scmp.ne.s32.totalorder %s367_s11, %s490_s12 }
  0x2b   :  { %406 = vmatprep.subr.mxu0 %v541_v0  ;;  %p495_p2 = scmp.lt.s32.totalorder %s367_s11, %s367_s11  ;;  %p496_p3 = scmp.lt.s32.totalorder %s490_s12, %s490_s12 }
  0x2c   :  { %407 = vmatpush3.msra.mxu0 %v240_v5 }
  0x2d   :  { %409 = vmatmul.mubr.msk.f32.vlgmr.msra.gmra.mxu0 %vm245_vm3, %v242_v6  ;;  %p497_p4 = por %p496_p3, %p495_p2 }
  0x2f   :  { %p498_p5 = pnand %p497_p4, %p491_p1 }
  0xe9   :  { %v151_v8 = vpop.f32.mrf.mxu0 }
  0xea   :  { %v152_v9 = vadd.f32 %v380_v7, %v151_v8 }
  0xeb   :  { %v398_v10 = vpop.f32.mrf.mxu0 }
  0xec   :  { %v155_v11 = vmax.f32 %v152_v9, 0.0 }
  0xed   :  { %v315_v12 = vpop.f32.mrf.mxu0 }
  0xee   :  { %402 = vmatmul.mubr.msk.f32.vlgmr.msra.gmra.mxu1 %vm164_vm4, %v155_v11 }
  0xef   :  { %v410_v13 = vpop.f32.mrf.mxu0 }
 0x1ae   :  { %v234_v15 = vpop.f32.mrf.mxu1 }
 0x1af   :  { %v235_v16 = vadd.f32 %v383_v14, %v234_v15 }
 0x1b0   :  { %v403_v17 = vpop.f32.mrf.mxu1 }
 0x1b1   :  { %239 = vst.msk [vmem:[#allocation2] sm:$0xff] %vm238_vm5, %v235_v16 }
 0x1b8   :  { %v244_v18 = vld [vmem:[#allocation2] sm:$0xff] }
 0x1b9   :  { %v319_v19 = vadd.f32 %v315_v12, %v244_v18 }
 0x1bb   :  { %v386_v20 = vmul.f32 -1.442695, %v319_v19 }
 0x1bd   :  { %422 = vpow2.f32 %v386_v20 }
 0x1ca   :  { %v423_v21 = vpop.eup %422 }
 0x1cb   :  { %v323_v22 = vadd.f32 1.0, %v423_v21 }
 0x1cd   :  { %424 = vrcp.f32 %v323_v22 }
 0x1ce   :  { %426 = vtanh.f32 %v319_v19 }
 0x1da   :  { %v425_v23 = vpop.eup %424 }
 0x1db   :  { %328 = vrot.lane.b32.xlu0 %v425_v23, %s543_s4  ;;  %v427_v24 = vpop.eup %426 }
 0x1df   :  { %333 = vrot.lane.b32.xlu0 %v427_v24, %s544_s30 }
 0x24d   :  { %v329_v25 = vpop.permute.xlu0 %328 }
 0x24e   :  { %v331_v28 = vmul.f32 %v329_v25, %v243_v26 }
 0x251   :  { %v334_v27 = vpop.permute.xlu0 %333 }
 0x252   :  { %v336_v29 = vmul.f32 %v425_v23, %v334_v27 }
 0x254   :  { %v337_v30 = vadd.f32 %v336_v29, %v331_v28 }
 0x256   :  { %428 = vtanh.f32 %v337_v30  ;;  %349 = vst.msk [vmem:[#allocation10] sm:$0xff] %vm245_vm3, %v337_v30 }
 0x263   :  { %v429_v31 = vpop.eup %428 }
 0x264   :  { %340 = vrot.lane.b32.xlu1 %v429_v31, %s545_s7 }
 0x265   :  { %501 = shalt.err (!%p498_p5)
}
 0x266   :  { %369 = dma.vmem_to_hbm [thread:$0]  %s367_s11, 128, %s644_s9, [#allocation11]  }
 0x267   :  { %s547_s15 = smov 96   ;;  %s548_s16 = smov [#allocation9]  }
 0x268   :  { %s356_s17 = sshll.u32 %s548_s16, 4  ;;  %s357_s17 = int_to_ptr.vmem [resolvable:$true] %s356_s17 }
 0x269   :  { %s510_s18 = scalar_lea.vmem %s357_s17, 128  ;;  %p515_p7 = scmp.lt.s32.totalorder %s357_s17, %s357_s17 }
 0x26a   :  { %p511_p6 = scmp.ne.s32.totalorder %s357_s17, %s510_s18  ;;  %p516_p8 = scmp.lt.s32.totalorder %s510_s18, %s510_s18 }
 0x26c   :  { %p517_p9 = por %p516_p8, %p515_p7 }
 0x26e   :  { %p518_p10 = pnand %p517_p9, %p511_p6 }
 0x2d6   :  { %v341_v32 = vpop.permute.xlu1 %340 }
 0x2d7   :  { %v343_v33 = vmul.f32 %v425_v23, %v341_v32 }
 0x2d9   :  { %345 = vrot.lane.b32.xlu1 %v343_v33, %s547_s15 }
 0x34b   :  { %v346_v34 = vpop.permute.xlu1 %345 }
 0x34c   :  { %348 = vst.msk [vmem:[#allocation9] sm:$0xff] %vm245_vm3, %v346_v34 }
 0x34d   :  { %521 = shalt.err (!%p518_p10)
}
 0x34e   :  { %359 = dma.vmem_to_hbm [thread:$0]  %s357_s17, 128, %s643_s8, [#allocation5]  }
 0x34f   :  { %534 = dma.done.wait [#allocation5], 128  }
 0x350   :  { %535 = vsyncadd [#allocation5], 4294967168 }
 0x351   :  { %536 = dma.done.wait [#allocation11], 128  }
 0x352   :  { %537 = vsyncadd [#allocation11], 4294967168 }
 0x353   :  { %376 = vsyncpa [#allocation4], 1 }
 0x354   :  { %377 = vsyncpa [#allocation7], 1 }
 0x355   :  { %378 = vsyncpa [#allocation5], 1 }
 0x356   :  { %379 = vsyncpa [#allocation11], 1 }

</bundles_post_ra>
